<compile_context>
chip_gen: v7x
topology: tpu7x:2x2x1
jax: 0.10.0
libtpu: 0.0.40
codegen_flags: <defaults>
</compile_context>

<pallas_src>
import functools

import jax
import jax.numpy as jnp
from jax.experimental import pallas as pl
from jax.experimental.pallas import tpu as pltpu


def _pick_tile(dim, pref, mult):
    """Largest tile <= pref that divides `dim` and is a multiple of `mult`,
    falling back to the full dimension (always legal for a BlockSpec)."""
    if dim <= pref:
        return dim
    t = (pref // mult) * mult
    while t >= mult:
        if dim % t == 0:
            return t
        t -= mult
    return dim


def _minigpt_kernel_acc(x_ref, w_ref, b_ref, o_ref, acc_ref):
    """General path: K split across grid axis 2, accumulate in f32 scratch."""
    k = pl.program_id(2)

    @pl.when(k == 0)
    def _():
        acc_ref[...] = jnp.zeros_like(acc_ref)

    acc_ref[...] += jnp.dot(x_ref[...], w_ref[...],
                            preferred_element_type=jnp.float32)

    @pl.when(k == pl.num_programs(2) - 1)
    def _():
        o_ref[...] = (acc_ref[...]
                      + b_ref[...].astype(jnp.float32)).astype(o_ref.dtype)


def _minigpt_kernel_single_k(x_ref, w_ref, b_ref, o_ref):
    """Fast path: whole K in one tile -> no scratch, no init/finalize gates."""
    acc = jnp.dot(x_ref[...], w_ref[...], preferred_element_type=jnp.float32)
    o_ref[...] = (acc + b_ref[...].astype(jnp.float32)).astype(o_ref.dtype)


@functools.partial(jax.jit, static_argnames=("tm", "tn", "tk"))
def minigpt_forward(x, w, b, *, tm=256, tn=256, tk=512):
    """x: (B, T, C); w: (4*C, ouc) (PyTorch weight transposed); b: (ouc,)."""
    B, T, C = x.shape
    if T % 4 != 0:
        raise ValueError("num_tokens must be divisible by 4")
    K = 4 * C
    N = w.shape[1]
    M = B * (T // 4)

    # Token regroup (B,T,C)->(B,T//4,4C) and batch flatten are contiguous
    # row-major reshapes: zero data movement, done outside the kernel.
    x2 = x.reshape(M, K)
    b2 = b.reshape(1, N)

    tm = _pick_tile(M, tm, 8)
    tn = _pick_tile(N, tn, 128)
    tk = _pick_tile(K, tk, 128)

    single_k = (tk == K)
    itemsize = jnp.dtype(x.dtype).itemsize
    cost = pl.CostEstimate(
        flops=2 * M * N * K,
        transcendentals=0,
        bytes_accessed=itemsize * (M * K + K * N + M * N) + 4 * N,
    )
    cparams = pltpu.CompilerParams(
        dimension_semantics=("parallel", "parallel", "arbitrary"),
        vmem_limit_bytes=96 << 20,
    )

    if single_k:
        grid = (M // tm, N // tn, 1)
        out = pl.pallas_call(
            _minigpt_kernel_single_k,
            out_shape=jax.ShapeDtypeStruct((M, N), x.dtype),
            grid_spec=pltpu.PrefetchScalarGridSpec(
                num_scalar_prefetch=0,
                grid=grid,
                in_specs=[
                    pl.BlockSpec((tm, K), lambda i, j, k: (i, 0)),
                    pl.BlockSpec((K, tn), lambda i, j, k: (0, j)),
                    pl.BlockSpec((1, tn), lambda i, j, k: (0, j)),
                ],
                out_specs=pl.BlockSpec((tm, tn), lambda i, j, k: (i, j)),
            ),
            compiler_params=cparams,
            cost_estimate=cost,
        )(x2, w, b2)
    else:
        grid = (M // tm, N // tn, K // tk)
        out = pl.pallas_call(
            _minigpt_kernel_acc,
            out_shape=jax.ShapeDtypeStruct((M, N), x.dtype),
            grid_spec=pltpu.PrefetchScalarGridSpec(
                num_scalar_prefetch=0,
                grid=grid,
                in_specs=[
                    pl.BlockSpec((tm, tk), lambda i, j, k: (i, k)),
                    pl.BlockSpec((tk, tn), lambda i, j, k: (k, j)),
                    pl.BlockSpec((1, tn), lambda i, j, k: (0, j)),
                ],
                out_specs=pl.BlockSpec((tm, tn), lambda i, j, k: (i, j)),
                scratch_shapes=[pltpu.VMEM((tm, tn), jnp.float32)],
            ),
            compiler_params=cparams,
            cost_estimate=cost,
        )(x2, w, b2)

    return out.reshape(B, T // 4, N)


if __name__ == "__main__":
    key = jax.random.PRNGKey(0)
    kx, kw, kb = jax.random.split(key, 3)

    # Small shapes consistent with the module: mm_hidden_size=128,
    # hidden_size=128, 16 tokens (divisible by 4), batch 2.
    B, T, C, OUC = 2, 16, 128, 128
    x = jax.random.normal(kx, (B, T, C), jnp.float32)
    w = jax.random.normal(kw, (4 * C, OUC), jnp.float32) * 0.02
    b = jax.random.normal(kb, (OUC,), jnp.float32) * 0.01

    # Pure-JAX reference of the PyTorch forward.
    ref = x.reshape(B, T // 4, 4 * C) @ w + b

    # Path 1: K split across grid (exercises the f32 accumulator / pl.when path).
    out_acc = jax.block_until_ready(minigpt_forward(x, w, b, tk=256))
    # Path 2: whole K in one tile (exercises the no-scratch fast path).
    out_fast = jax.block_until_ready(minigpt_forward(x, w, b, tk=512))

    for out in (out_acc, out_fast):
        assert out.shape == (B, T // 4, OUC), out.shape
        assert bool(jnp.all(jnp.isfinite(out)))
        assert jnp.allclose(out, ref, atol=1e-4, rtol=1e-4), float(
            jnp.max(jnp.abs(out - ref)))

    print("KERNEL_OK")
</pallas_src>

<mosaic_0001>
module attributes {stable_mosaic.version = 11 : i64} {
  func.func @_minigpt_kernel_acc(%arg0: i32, %arg1: i32, %arg2: i32, %arg3: memref<8x256xf32, #tpu.memory_space<vmem>>, %arg4: memref<256x128xf32, #tpu.memory_space<vmem>>, %arg5: memref<1x128xf32, #tpu.memory_space<vmem>>, %arg6: memref<8x128xf32, #tpu.memory_space<vmem>>, %arg7: memref<8x128xf32, #tpu.memory_space<vmem>>) attributes {dimension_semantics = [#tpu.dimension_semantics<parallel>, #tpu.dimension_semantics<parallel>, #tpu.dimension_semantics<arbitrary>], iteration_bounds = array<i64: 1, 1, 2>, scalar_prefetch = 0 : i64, scratch_operands = 1 : i64, tpu.core_type = #tpu.core_type<tc>, window_params = [{transform_indices = @transform_0, window_bounds = array<i64: 8, 256>}, {transform_indices = @transform_1, window_bounds = array<i64: 256, 128>}, {transform_indices = @transform_2, window_bounds = array<i64: 1, 128>}, {transform_indices = @transform_3, window_bounds = array<i64: 8, 128>}]} {
    %c0_i32 = arith.constant 0 : i32
    %0 = arith.cmpi eq, %arg2, %c0_i32 : i32
    %1 = arith.extui %0 : i1 to i32
    %c0_i32_0 = arith.constant 0 : i32
    %2 = arith.cmpi ne, %1, %c0_i32_0 : i32
    scf.if %2 {
      %cst_9 = arith.constant 0.000000e+00 : f32
      %12 = vector.broadcast %cst_9 : f32 to vector<8x128xf32>
      %c0_10 = arith.constant 0 : index
      %c0_11 = arith.constant 0 : index
      %13 = vector.load %arg7[%c0_10, %c0_11] : memref<8x128xf32, #tpu.memory_space<vmem>>, vector<8x128xf32>
      tpu.vector_store %arg7[%c0_10, %c0_11], %12 {strides = array<i32>} : memref<8x128xf32, #tpu.memory_space<vmem>>, vector<8x128xf32>,
    } else {
    }
    %c0 = arith.constant 0 : index
    %c0_1 = arith.constant 0 : index
    %3 = vector.load %arg7[%c0, %c0_1] : memref<8x128xf32, #tpu.memory_space<vmem>>, vector<8x128xf32>
    %c0_2 = arith.constant 0 : index
    %c0_3 = arith.constant 0 : index
    %4 = vector.load %arg3[%c0_2, %c0_3] : memref<8x256xf32, #tpu.memory_space<vmem>>, vector<8x256xf32>
    %c0_4 = arith.constant 0 : index
    %c0_5 = arith.constant 0 : index
    %5 = vector.load %arg4[%c0_4, %c0_5] : memref<256x128xf32, #tpu.memory_space<vmem>>, vector<256x128xf32>
    %cst = arith.constant dense<0.000000e+00> : vector<8x128xf32>
    %6 = tpu.matmul %4, %5, %cst {dimension_numbers = #tpu.dot_dimension_numbers<[1], [0], [0], [1], [0, 0, 1, 1], [], []>} : vector<8x256xf32>, vector<256x128xf32>, vector<8x128xf32> -> vector<8x128xf32>
    %7 = arith.addf %3, %6 : vector<8x128xf32>
    %c0_6 = arith.constant 0 : index
    %c0_7 = arith.constant 0 : index
    %8 = vector.load %arg7[%c0_6, %c0_7] : memref<8x128xf32, #tpu.memory_space<vmem>>, vector<8x128xf32>
    tpu.vector_store %arg7[%c0_6, %c0_7], %7 {strides = array<i32>} : memref<8x128xf32, #tpu.memory_space<vmem>>, vector<8x128xf32>,
    %c1_i32 = arith.constant 1 : i32
    %9 = arith.cmpi eq, %arg2, %c1_i32 : i32
    %10 = arith.extui %9 : i1 to i32
    %c0_i32_8 = arith.constant 0 : i32
    %11 = arith.cmpi ne, %10, %c0_i32_8 : i32
    scf.if %11 {
      %c0_9 = arith.constant 0 : index
      %c0_10 = arith.constant 0 : index
      %12 = vector.load %arg7[%c0_9, %c0_10] : memref<8x128xf32, #tpu.memory_space<vmem>>, vector<8x128xf32>
      %c0_11 = arith.constant 0 : index
      %c0_12 = arith.constant 0 : index
      %13 = vector.load %arg5[%c0_11, %c0_12] : memref<1x128xf32, #tpu.memory_space<vmem>>, vector<1x128xf32>
      %14 = vector.broadcast %13 : vector<1x128xf32> to vector<8x128xf32>
      %15 = arith.addf %12, %14 : vector<8x128xf32>
      %c0_13 = arith.constant 0 : index
      %c0_14 = arith.constant 0 : index
      %16 = vector.load %arg6[%c0_13, %c0_14] : memref<8x128xf32, #tpu.memory_space<vmem>>, vector<8x128xf32>
      tpu.vector_store %arg6[%c0_13, %c0_14], %15 {strides = array<i32>} : memref<8x128xf32, #tpu.memory_space<vmem>>, vector<8x128xf32>,
    } else {
    }
    return
  }
  func.func @transform_0(%arg0: i32, %arg1: i32, %arg2: i32) -> (i32, i32) {
    %c0_i32 = arith.constant 0 : i32
    return %arg0, %arg2 : i32, i32
  }
  func.func @transform_1(%arg0: i32, %arg1: i32, %arg2: i32) -> (i32, i32) {
    %c0_i32 = arith.constant 0 : i32
    return %arg2, %arg1 : i32, i32
  }
  func.func @transform_2(%arg0: i32, %arg1: i32, %arg2: i32) -> (i32, i32) {
    %c0_i32 = arith.constant 0 : i32
    %c0_i32_0 = arith.constant 0 : i32
    return %c0_i32, %arg1 : i32, i32
  }
  func.func @transform_3(%arg0: i32, %arg1: i32, %arg2: i32) -> (i32, i32) {
    %c0_i32 = arith.constant 0 : i32
    return %arg0, %arg1 : i32, i32
  }
}

</mosaic_0001>

<bundles_post_ra>
// kernel: minigpt_forward.1
= control target key start
LH: loop header
LB: loop body
LE: loop exit
PB: predicated region body
PF: predicated region fallthrough
CT: control target
= control target key end

     0   :  { %8 = vsyncpa [#allocation4], 0  ;;  %s1163_s0 = inlined_call_operand.hbm [shape: f32[8,512], index: 0, kind: input, shape index: {}]   ;;  %s1164_s1 = inlined_call_operand.hbm [shape: f32[512,128], index: 1, kind: input, shape index: {}]   ;;  %s1165_s2 = inlined_call_operand.hbm [shape: f32[1,128], index: 2, kind: input, shape index: {}]   ;;  %s1166_s3 = inlined_call_operand.hbm [shape: f32[8,128], index: 3, kind: output, shape index: {}]  }
   0x1   :  { %10 = vsyncpa [#allocation4 + $0x1], 0 }
   0x2   :  { %11 = vsyncpa [#allocation7], 0 }
   0x3   :  { %13 = vsyncpa [#allocation7 + $0x1], 0 }
   0x4   :  { %14 = vsyncpa [#allocation5], 0  ;;  %s885_s12 = smov 0   ;;  %s887_s13 = smov 0  }
   0x5   :  { %s889_s14 = smov 0   ;;  %s891_s15 = smov 0  }
   0x6   :  { %s893_s16 = smov 0   ;;  %s895_s17 = smov 0  }
   0x7 LB: > { %s914_s18 = sadd.s32 4294967295, %s856_s17   ;;  %s48_s19 = sadd.s32 1, %s844_s14  ;;  %s856_s17 = sphi %s895_s17, %s20_s17   ;;  %s852_s16 = sphi %s893_s16, %s1187_s16   ;;  %s848_s15 = sphi %s891_s15, %s1186_s15   ;;  %s844_s14 = sphi %s889_s14, %s1185_s14   ;;  %s840_s13 = sphi %s887_s13, %s1184_s13   ;;  %s836_s12 = sphi %s885_s12, %s1183_s12  }
   0x8   : > { %p55_p0 = scmp.ne.s32.totalorder %s844_s14, %s840_s13  ;;  %p61_p1 = scmp.ne.s32.totalorder %s840_s13, %s836_s12 }
   0x9   : > { %p1167_p2 = scmp.eq.s32.totalorder %s914_s18, 0  ;;  %p510_p3 = scmp.ge.s32.totalorder %s856_s17, 1 }
   0xa   : > { %p154_p4 = scmp.lt.s32.totalorder %s856_s17, 3  ;;  %s858_s22 = smov [#allocation8]  }
   0xb   : > { %p925_p5 = por %p1167_p2, %p61_p1  ;;  %s169_s23 = sshll.u32 %s858_s22, 4  ;;  %s170_s23 = int_to_ptr.vmem [resolvable:$true] %s169_s23 }
   0xc   : > { %p929_p6 = pnand %p510_p3, %p154_p4  ;;  %p56_p8 = scmp.eq.s32.totalorder %s856_s17, 0 }
   0xd   : > { %s1170_s20 = scalar_select %p925_p5, 1, 0 }
   0xe   : > { %s1171_s21 = scalar_select %p929_p6, 1, 0 }
   0xf   : > { %p611_p7 = pneg %p929_p6  ;;  %s32_s25 = sadd.s32 1, %s852_s16 }
  0x10   : > { %p943_p10 = scmp.ge.s32.totalorder %s32_s25, 2  ;;  %p950_p11 = por %p56_p8, %p55_p0 }
  0x11   : > { %p938_p9 = pnand %p611_p7, %p1167_p2  ;;  %s680_s30 = scalar_lea.hbm %s1165_s2, 16 }
  0x12   : > { %s1173_s26 = scalar_select %p943_p10, 1, 0 }
  0x13   : > { %s1174_s27 = scalar_select %p950_p11, 1, 0 }
  0x14   : > { %p681_p13 = scmp.ne.s32.totalorder %s1165_s2, %s680_s30  ;;  %p682_p1 = pneg %p938_p9 }
  0x15   : > { %p687_p0 = scmp.lt.u32.totalorder %s680_s30, %s1165_s2 }
  0x16   : > { %p683_p3 = pnand %p682_p1, %p681_p13 }
  0x18   : > { %p684_p4 = pneg %p683_p3 }
  0x1a   : > { %p689_p7 = pnand %p687_p0, %p684_p4 }
  0x1c   : > { %692 = shalt.err (!%p689_p7)
}
  0x1d   : > { %s693_s8 = scalar_lea.vmem %s170_s23, 16  ;;  %s700_s9 = scalar_lea.vmem %s170_s23, 32 }
  0x1e   : > { %p694_p8 = scmp.ne.s32.totalorder %s170_s23, %s693_s8  ;;  %p701_p5 = scmp.lt.s32.totalorder %s170_s23, %s170_s23 }
  0x1f   : > { %p702_p6 = scmp.lt.s32.totalorder %s700_s9, %s693_s8 }
  0x20   : > { %p696_p2 = pnand %p694_p8, %p682_p1 }
  0x21   : > { %p703_p11 = por %p702_p6, %p701_p5 }
  0x22   : > { %p697_p12 = pneg %p696_p2 }
  0x24   : > { %p704_p10 = pnand %p703_p11, %p697_p12 }
  0x26   : > { %707 = shalt.err (!%p704_p10)
}
  0x27   : > { %614 = dma.hbm_to_vmem [thread:$0]  (!%p938_p9), %s1165_s2, 16, %s170_s23, [#allocation7]  }
  0x28   : > { %p1175_p2 = scmp.ne.s32.totalorder %s1173_s26, 0  ;;  %s976_s12 = sand.u32 1, %s844_s14  }
  0x29   : > { %s530_s22 = sshll.u32 %s852_s16, 8  ;;  %s513_s28 = sshll.u32 %s976_s12, 4 }
  0x2a   : > { %s1189_s25 = smov (%p1175_p2, %s32_s25), 0  ;;  %s985_s4 = scalar_lea.hbm %s1163_s0, %s530_s22 }
  0x2b   : > { %s44_s24 = ssub.s32 %s852_s16, %s1189_s25  ;;  %s184_s26 = scalar_lea.vmem [#allocation3], %s513_s28 }
  0x2c   : > { %p46_p5 = scmp.eq.s32.totalorder %s44_s24, 0  ;;  %s194_s5 = sshll.u32 %s184_s26, 4  ;;  %s1000_s5 = int_to_ptr.vmem [resolvable:$true] %s194_s5 }
  0x2d   : > { %p1176_p6 = scmp.ne.s32.totalorder %s1174_s27, 0  ;;  %p1177_p9 = scmp.lt.s32.totalorder %s856_s17, 2 }
  0x2e   : > { %s990_s23 = scalar_select %p46_p5, %s844_s14, %s48_s19  }
  0x2f   : > { %p996_p10 = pnand %p1177_p9, %p1176_p6  ;;  %s516_s7 = sshll.u32 %s976_s12, 8 }
  0x30   : > { %s181_s8 = scalar_lea.sflag [#allocation4], %s976_s12  ;;  %s708_s9 = scalar_lea.hbm %s985_s4, 256 }
  0x31   : > { %p709_p11 = scmp.ne.s32.totalorder %s985_s4, %s708_s9  ;;  %p710_p12 = pneg %p996_p10 }
  0x32   : > { %s713_s10 = scalar_lea.hbm %s1163_s0, 512  ;;  %p714_p3 = scmp.lt.u32.totalorder %s985_s4, %s1163_s0 }
  0x33   : > { %p711_p13 = pnand %p710_p12, %p709_p11  ;;  %p715_p4 = scmp.lt.u32.totalorder %s713_s10, %s708_s9 }
  0x34   : > { %p717_p7 = scmp.lt.u32.totalorder %s708_s9, %s985_s4 }
  0x35   : > { %p712_p1 = pneg %p711_p13  ;;  %p716_p0 = por %p715_p4, %p714_p3 }
  0x37   : > { %p718_p8 = por %p717_p7, %p716_p0 }
  0x39   : > { %p719_p2 = pnand %p718_p8, %p712_p1 }
  0x3b   : > { %722 = shalt.err (!%p719_p2)
}
  0x3c   : > { %s723_s24 = scalar_lea.vmem %s1000_s5, 256  ;;  %s859_s28 = smov [#allocation3]  }
  0x3d   : > { %p724_p5 = scmp.ne.s32.totalorder %s1000_s5, %s723_s24  ;;  %s728_s29 = sshll.u32 %s859_s28, 4  ;;  %s729_s29 = int_to_ptr.vmem [resolvable:$false] %s728_s29 }
  0x3e   : > { %s730_s30 = scalar_lea.vmem %s729_s29, 512  ;;  %p731_p11 = scmp.lt.s32.totalorder %s1000_s5, %s729_s29 }
  0x3f   : > { %p726_p6 = pnand %p724_p5, %p710_p12  ;;  %p732_p13 = scmp.lt.s32.totalorder %s730_s30, %s723_s24 }
  0x41   : > { %p727_p9 = pneg %p726_p6  ;;  %p733_p3 = por %p732_p13, %p731_p11 }
  0x43   : > { %p734_p4 = pnand %p733_p3, %p727_p9 }
  0x45   : > { %737 = shalt.err (!%p734_p4)
}
  0x46   : > { %618 = dma.hbm_to_vmem [thread:$0]  (!%p996_p10), %s985_s4, 256, %s1000_s5, %s181_s8  }
  0x47   : > { %s531_s26 = sshll.u32 %s852_s16, 12  ;;  %s205_s9 = scalar_lea.vmem [#allocation6], %s516_s7 }
  0x48   : > { %s213_s19 = sshll.u32 %s205_s9, 4  ;;  %s201_s27 = sand.u32 1, %s856_s17   ;;  %s1032_s19 = int_to_ptr.vmem [resolvable:$true] %s213_s19 }
  0x49   : > { %s1038_s22 = scalar_lea.hbm %s1164_s1, %s531_s26  ;;  %s1040_s24 = scalar_lea.sflag [#allocation7], %s201_s27 }
  0x4a   : > { %s738_s28 = scalar_lea.hbm %s1038_s22, 4096  ;;  %s743_s5 = scalar_lea.hbm %s1164_s1, 8192 }
  0x4b   : > { %p739_p1 = scmp.ne.s32.totalorder %s1038_s22, %s738_s28  ;;  %p744_p8 = scmp.lt.u32.totalorder %s1038_s22, %s1164_s1 }
  0x4c   : > { %p745_p2 = scmp.lt.u32.totalorder %s743_s5, %s738_s28  ;;  %p747_p6 = scmp.lt.u32.totalorder %s738_s28, %s1038_s22 }
  0x4d   : > { %p741_p0 = pnand %p739_p1, %p710_p12 }
  0x4e   : > { %p746_p5 = por %p745_p2, %p744_p8 }
  0x4f   : > { %p742_p7 = pneg %p741_p0 }
  0x50   : > { %p748_p9 = por %p747_p6, %p746_p5 }
  0x52   : > { %p749_p11 = pnand %p748_p9, %p742_p7 }
  0x54   : > { %752 = shalt.err (!%p749_p11)
}
  0x55   : > { %s753_s29 = scalar_lea.vmem %s1032_s19, 4096  ;;  %s860_s30 = smov [#allocation6]  }
  0x56   : > { %p754_p13 = scmp.ne.s32.totalorder %s1032_s19, %s753_s29  ;;  %s758_s26 = sshll.u32 %s860_s30, 4  ;;  %s759_s26 = int_to_ptr.vmem [resolvable:$false] %s758_s26 }
  0x57   : > { %s760_s9 = scalar_lea.vmem %s759_s26, 8192  ;;  %p761_p1 = scmp.lt.s32.totalorder %s1032_s19, %s759_s26 }
  0x58   : > { %p756_p3 = pnand %p754_p13, %p710_p12  ;;  %p762_p0 = scmp.lt.s32.totalorder %s760_s9, %s753_s29 }
  0x5a   : > { %p757_p4 = pneg %p756_p3  ;;  %p763_p8 = por %p762_p0, %p761_p1 }
  0x5c   : > { %p764_p2 = pnand %p763_p8, %p757_p4 }
  0x5e   : > { %767 = shalt.err (!%p764_p2)
}
  0x5f   : > { %s861_s27 = smov 128   ;;  %s862_s10 = smov 8  }
  0x60   : > { %621 = dma.hbm_to_vmem [thread:$0]  (!%p996_p10), %s1038_s22, 4096, %s1032_s19, %s1040_s24, %s861_s27, %s861_s27, %s862_s10  }
  0x61   : > { %p1179_p12 = scmp.ne.s32.totalorder %s1171_s21, 0 }
  0x62   : > { %s227_s11 = sand.u32 (!%p1179_p12), 1, %s840_s13   ;;  %p1180_p7 = scmp.ne.s32.totalorder (!%p1179_p12), %s1170_s20, 0 }
  0x63   : > { %225 = sbr.rel (%p1179_p12) target bundleno = 410 (0x19a), region = 32  ;;  %s520_s28 = sshll.u32 (!%p1179_p12), %s227_s11, 4 }
  0x64   : > { %s228_s12 = scalar_lea.sflag (!%p1179_p12), [#allocation4], %s227_s11  ;;  %s1069_s4 = scalar_lea.vmem (!%p1179_p12), [#allocation3], %s520_s28 }
  0x6a   : > { %819 = dma.done.wait (%p1180_p7), %s228_s12, 256  }
  0x6b   : > { %821 = vsyncadd (%p1180_p7), %s228_s12, 4294967040  ;;  %s236_s5 = sand.u32 1, %s914_s18   ;;  %s521_s6 = sshll.u32 %s227_s11, 8 }
  0x6c   : > { %s237_s19 = scalar_lea.sflag [#allocation7], %s236_s5  ;;  %s1076_s22 = scalar_lea.vmem [#allocation6], %s521_s6 }
  0x6d   : > { %823 = dma.done.wait (%p1180_p7), %s237_s19, 4096  }
  0x6e   : > { %825 = vsyncadd (%p1180_p7), %s237_s19, 4294963200  ;;  %p1181_p10 = scmp.eq.s32.totalorder %s914_s18, 0 }
  0x70   : > { %827 = dma.done.wait (%p1181_p10), [#allocation7], 16   ;;  %p1182_p5 = pmov %p1181_p10 }
  0x71   : > { %p523_p6 = scmp.ne.s32.totalorder %s848_s15, 0 }
  0x72   : > { %829 = vsyncadd (%p1182_p5), [#allocation7], 4294967280  ;;  %v863_v0 = vmov (!%p523_p6), 0.0  }
  0x73   : > { %272 = sbr.rel (%p523_p6) target bundleno = 122 (0x7a), region = 48  ;;  %273 = vst [vmem:[#allocation2] sm:$0xff] (!%p523_p6), %v863_v0 }
  0x7a PF: > { %v293_v1 = vld [vmem:[%s1076_s22 + $0x80] sm:$0xff]  ;;  %v294_v2 = vld [vmem:[%s1076_s22 + $0x88] sm:$0xff]  ;;  %v295_v6 = vld [vmem:[%s1076_s22 + $0x90] sm:$0xff]  ;;  %p524_p9 = scmp.ne.s32.totalorder %s848_s15, 1 }
  0x7b   : > { %v277_v3 = vld [vmem:[%s1076_s22] sm:$0xff]  ;;  %v567_v4 = vpack.c.bf16 %v294_v2, %v293_v1  ;;  %v278_v5 = vld [vmem:[%s1076_s22 + $0x8] sm:$0xff]  ;;  %v296_v7 = vld [vmem:[%s1076_s22 + $0x98] sm:$0xff] }
  0x7c   : > { %v569_v8 = vpack.c.bf16 %v278_v5, %v277_v3  ;;  %v571_v9 = vpack.c.bf16 %v296_v7, %v295_v6  ;;  %v279_v10 = vld [vmem:[%s1076_s22 + $0x10] sm:$0xff]  ;;  %v280_v11 = vld [vmem:[%s1076_s22 + $0x18] sm:$0xff]  ;;  %v297_v12 = vld [vmem:[%s1076_s22 + $0xa0] sm:$0xff] }
  0x7d   : > { %568 = vmatprep.subr.bf16.mxu0 %v567_v4  ;;  %v298_v13 = vld [vmem:[%s1076_s22 + $0xa8] sm:$0xff]  ;;  %v573_v14 = vpack.c.bf16 %v280_v11, %v279_v10  ;;  %v281_v16 = vld [vmem:[%s1076_s22 + $0x20] sm:$0xff]  ;;  %v299_v18 = vld [vmem:[%s1076_s22 + $0xb0] sm:$0xff] }
  0x7e   : > { %570 = vmatpush3.bf16.msra.mxu0 %v569_v8  ;;  %v575_v15 = vpack.c.bf16 %v298_v13, %v297_v12  ;;  %v282_v17 = vld [vmem:[%s1076_s22 + $0x28] sm:$0xff]  ;;  %v300_v19 = vld [vmem:[%s1076_s22 + $0xb8] sm:$0xff]  ;;  %v283_v22 = vld [vmem:[%s1076_s22 + $0x30] sm:$0xff] }
  0x7f   : > { %572 = vmatprep.subr.bf16.mxu0 %v571_v9  ;;  %v577_v20 = vpack.c.bf16 %v282_v17, %v281_v16  ;;  %v579_v21 = vpack.c.bf16 %v300_v19, %v299_v18  ;;  %v284_v23 = vld [vmem:[%s1076_s22 + $0x38] sm:$0xff]  ;;  %v301_v24 = vld [vmem:[%s1076_s22 + $0xc0] sm:$0xff]  ;;  %v302_v25 = vld [vmem:[%s1076_s22 + $0xc8] sm:$0xff] }
  0x80   : > { %v276_v26 = vld [vmem:[%s1069_s4 + $0x8] sm:$0xff]  ;;  %v581_v27 = vpack.c.bf16 %v284_v23, %v283_v22  ;;  %v583_v28 = vpack.c.bf16 %v302_v25, %v301_v24  ;;  %v285_v29 = vld [vmem:[%s1076_s22 + $0x40] sm:$0xff]  ;;  %v303_v31 = vld [vmem:[%s1076_s22 + $0xd0] sm:$0xff] }
  0x81   : > { %373 = vmatprep.mubr.f32.mxu0 %v276_v26  ;;  %v286_v30 = vld [vmem:[%s1076_s22 + $0x48] sm:$0xff]  ;;  %v304_v32 = vld [vmem:[%s1076_s22 + $0xd8] sm:$0xff]  ;;  %v287_v35 = vld [vmem:[%s1076_s22 + $0x50] sm:$0xff] }
  0x82   : > { %574 = vmatpush3.bf16.msra.mxu0 %v573_v14  ;;  %v585_v33 = vpack.c.bf16 %v286_v30, %v285_v29  ;;  %v587_v34 = vpack.c.bf16 %v304_v32, %v303_v31  ;;  %v288_v36 = vld [vmem:[%s1076_s22 + $0x58] sm:$0xff]  ;;  %v305_v37 = vld [vmem:[%s1076_s22 + $0xe0] sm:$0xff]  ;;  %v306_v38 = vld [vmem:[%s1076_s22 + $0xe8] sm:$0xff] }
  0x83   : > { %576 = vmatprep.subr.bf16.mxu0 %v575_v15  ;;  %v589_v39 = vpack.c.bf16 %v288_v36, %v287_v35  ;;  %v591_v40 = vpack.c.bf16 %v306_v38, %v305_v37  ;;  %v289_v41 = vld [vmem:[%s1076_s22 + $0x60] sm:$0xff]  ;;  %v290_v42 = vld [vmem:[%s1076_s22 + $0x68] sm:$0xff]  ;;  %v307_v43 = vld [vmem:[%s1076_s22 + $0xf0] sm:$0xff] }
  0x84   : > { %v308_v44 = vld [vmem:[%s1076_s22 + $0xf8] sm:$0xff]  ;;  %v593_v45 = vpack.c.bf16 %v290_v42, %v289_v41  ;;  %v291_v47 = vld [vmem:[%s1076_s22 + $0x70] sm:$0xff]  ;;  %v525_v57 = vld [vmem:[#allocation8] ss:$0 sm:$0xff] (!%p524_p9) }
  0x85   : > { %v595_v46 = vpack.c.bf16 %v308_v44, %v307_v43  ;;  %v292_v48 = vld [vmem:[%s1076_s22 + $0x78] sm:$0xff]  ;;  %v275_v50 = vld [vmem:[%s1069_s4] sm:$0xff] }
  0x86   : > { %578 = vmatpush3.bf16.msra.mxu0 %v577_v20  ;;  %v597_v49 = vpack.c.bf16 %v292_v48, %v291_v47  ;;  %v274_v52 = vld [vmem:[#allocation2] sm:$0xff] }
  0x87   : > { %580 = vmatprep.subr.bf16.mxu0 %v579_v21 }
  0x8a   : > { %582 = vmatpush3.bf16.msra.mxu0 %v581_v27 }
  0x8b   : > { %584 = vmatprep.subr.bf16.mxu0 %v583_v28 }
  0x8e   : > { %586 = vmatpush3.bf16.msra.mxu0 %v585_v33 }
  0x8f   : > { %588 = vmatprep.subr.bf16.mxu0 %v587_v34 }
  0x92   : > { %590 = vmatpush3.bf16.msra.mxu0 %v589_v39 }
  0x93   : > { %592 = vmatprep.subr.bf16.mxu0 %v591_v40 }
  0x96   : > { %594 = vmatpush3.bf16.msra.mxu0 %v593_v45 }
  0x97   : > { %596 = vmatprep.subr.bf16.mxu0 %v595_v46 }
  0x9a   : > { %598 = vmatpush3.bf16.msra.mxu0 %v597_v49 }
  0x9d   : > { %374 = vmatmul.mubr.f32.vlgmr.msra.gmra.mrb[0].mxu0 %v275_v50 }
 0x170   : > { %v564_v51 = vpop.f32.mrb[0].mxu0  ;;  %384 = sbr.rel (%p524_p9) target bundleno = 385 (0x181), region = 52 }
 0x171   : > { %v565_v53 = vpop.f32.mrb[1].mxu0 }
 0x172   : > { %v566_v54 = vadd.f32 %v565_v53, %v564_v51 }
 0x174   : > { %v379_v55 = vadd.f32 %v566_v54, %v274_v52 }
 0x176   : > { %380 = vst [vmem:[#allocation2] sm:$0xff] %v379_v55 }
 0x17d   : > { %v385_v56 = vld [vmem:[#allocation2] sm:$0xff] }
 0x17e   : > { %v393_v58 = vadd.f32 %v525_v57, %v385_v56 }
 0x180   : > { %394 = vst [vmem:[#allocation9] sm:$0xff] %v393_v58 }
 0x181 PF: > { %p625_p11 = scmp.eq.s32.totalorder %s914_s18, 1  ;;  %s864_s20 = smov [#allocation9]  }
 0x182   : > { %s405_s21 = sshll.u32 %s864_s20, 4  ;;  %s406_s21 = int_to_ptr.vmem [resolvable:$true] %s405_s21 }
 0x183   : > { %s768_s24 = scalar_lea.vmem %s406_s21, 128  ;;  %p775_p1 = scmp.lt.s32.totalorder %s406_s21, %s406_s21 }
 0x184   : > { %p769_p13 = scmp.ne.s32.totalorder %s406_s21, %s768_s24  ;;  %p776_p0 = scmp.lt.s32.totalorder %s768_s24, %s768_s24 }
 0x186   : > { %p770_p3 = pnand %p769_p13, %p625_p11  ;;  %p777_p8 = por %p776_p0, %p775_p1 }
 0x188   : > { %p771_p4 = pneg %p770_p3 }
 0x18a   : > { %p778_p2 = pnand %p777_p8, %p771_p4 }
 0x18c   : > { %781 = shalt.err (!%p778_p2)
}
 0x18d   : > { %s782_s8 = scalar_lea.hbm %s1166_s3, 128 }
 0x18e   : > { %p783_p12 = scmp.ne.s32.totalorder %s1166_s3, %s782_s8  ;;  %p788_p5 = scmp.lt.u32.totalorder %s782_s8, %s1166_s3 }
 0x190   : > { %p784_p7 = pnand %p783_p12, %p625_p11 }
 0x192   : > { %p785_p10 = pneg %p784_p7 }
 0x194   : > { %p790_p6 = pnand %p788_p5, %p785_p10 }
 0x196   : > { %793 = shalt.err (!%p790_p6)
}
 0x197   : > { %608 = dma.vmem_to_hbm [thread:$0]  (%p625_p11), %s406_s21, 128, %s1166_s3, [#allocation5]  }
 0x198   : > { %831 = dma.done.wait (%p625_p11), [#allocation5], 128  }
 0x199   : > { %833 = vsyncadd (%p625_p11), [#allocation5], 4294967168 }
 0x19a PF: > { %s20_s17 = sadd.s32 1, %s856_s17   ;;  %s1183_s12 = smov %s840_s13 }
 0x19b   : > { %p17_p9 = scmp.ge.s32.totalorder %s20_s17, 4   ;;  %s1184_s13 = smov %s844_s14 }
 0x19c   : > { %s1185_s14 = smov %s990_s23  ;;  %s1186_s15 = smov %s852_s16 }
 0x19d   : > { %s1187_s16 = smov %s1189_s25  ;;  %19 = sbr.rel (!%p17_p9) target bundleno = 7 (0x7), region = 96 }
 0x1a4   :  { %418 = vsyncpa [#allocation4], 1 }
 0x1a5   :  { %420 = vsyncpa [#allocation4 + $0x1], 1 }
 0x1a6   :  { %421 = vsyncpa [#allocation7], 1 }
 0x1a7   :  { %423 = vsyncpa [#allocation7 + $0x1], 1 }
 0x1a8   :  { %424 = vsyncpa [#allocation5], 1 }
 0x1a9   :  { %426 = vsyncpa [#allocation5 + $0x1], 1 }

</bundles_post_ra>
